<compile_context>
chip_gen: v6e
topology: v6e:2x2x1
jax: 0.10.0
libtpu: 0.0.40
codegen_flags: <defaults>
</compile_context>

<pallas_src>
import jax
import jax.numpy as jnp
import numpy as np
from jax.experimental import pallas as pl
from jax.experimental.pallas import tpu as pltpu

_LANE = 128
_SUBLANE = 8
_TARGET_TILE_BYTES = 2 * 1024 * 1024  # ~2 MiB per buffer: ~85% HBM roofline, fits all chips


def _identity_copy_kernel(in_ref, out_ref):
    # Straight VMEM copy of the current (tile_rows, cols) lane-dense tile.
    out_ref[...] = in_ref[...]


def _choose_flat_cols(n: int) -> int | None:
    """Pick a lane-dense column count (multiple of 128) that divides n."""
    for cols in (1024, 512, 256, 128):
        if n % cols == 0:
            return cols
    return None


def _choose_row_tile(rows: int, cols: int, itemsize: int) -> int | None:
    """Largest row tile that (a) divides rows, (b) is a multiple of 8 (or == rows),
    and (c) keeps one buffer under the byte budget."""
    max_rows = max(1, _TARGET_TILE_BYTES // (cols * itemsize))
    if rows <= max_rows:
        return rows  # single block covering the full array: always legal
    t = (max_rows // _SUBLANE) * _SUBLANE
    while t >= _SUBLANE:
        if rows % t == 0:
            return t
        t -= _SUBLANE
    return None


def double_identity(x: jax.Array, xb: jax.Array, cache_index: int) -> jax.Array:
    """Optimal Pallas-free equivalent of DoubleIdentity.forward: zero-copy passthrough."""
    del xb, cache_index  # unused, matching the reference module
    return x


def double_identity_pallas(x: jax.Array, xb: jax.Array, cache_index: int) -> jax.Array:
    """Explicit Pallas passthrough (identity copy) for when an op boundary is required."""
    del xb, cache_index  # unused, matching the reference module
    orig_shape = x.shape
    n = int(np.prod(orig_shape))

    cols = _choose_flat_cols(n)
    if cols is None:
        # Total size not a multiple of 128: a lane-dense copy would need padding.
        # Identity is already exact with zero work, so just pass through.
        return x

    rows = n // cols
    itemsize = jnp.dtype(x.dtype).itemsize
    tile_rows = _choose_row_tile(rows, cols, itemsize)
    if tile_rows is None:
        # No legal byte-budgeted tiling (odd row counts at huge sizes): pass through.
        return x

    flat = x.reshape(rows, cols)
    out_flat = pl.pallas_call(
        _identity_copy_kernel,
        out_shape=jax.ShapeDtypeStruct((rows, cols), x.dtype),
        grid=(rows // tile_rows,),
        in_specs=[pl.BlockSpec((tile_rows, cols), lambda i: (i, 0))],
        out_specs=pl.BlockSpec((tile_rows, cols), lambda i: (i, 0)),
        # Alias the (flattened) input buffer as the output buffer: no fresh HBM alloc.
        input_output_aliases={0: 0},
        compiler_params=pltpu.CompilerParams(
            # One grid axis, independent tiles -> shard across 2 TCs on v7x.
            dimension_semantics=("parallel",),
        ),
    )(flat)
    return out_flat.reshape(orig_shape)


if __name__ == "__main__":
    key = jax.random.PRNGKey(0)
    k1, k2 = jax.random.split(key)
    # Shapes consistent with a typical NCHW input to the module.
    x = jax.random.normal(k1, (2, 4, 16, 16), dtype=jnp.float32)
    xb = jax.random.normal(k2, (2, 4, 16, 16), dtype=jnp.float32)
    cache_index = 0

    # Snapshot expected values before calling (input buffer may be aliased/donated).
    expected = np.asarray(x)

    # Zero-copy fast path (recommended): forward is a pure identity.
    out_fast = double_identity(x, xb, cache_index)
    out_fast = jax.block_until_ready(out_fast)
    assert out_fast.shape == x.shape and out_fast.dtype == x.dtype
    assert np.array_equal(np.asarray(out_fast), expected)

    # Explicit Pallas kernel path.
    out = double_identity_pallas(x, xb, cache_index)
    out = jax.block_until_ready(out)
    assert out.shape == x.shape and out.dtype == x.dtype
    assert np.array_equal(np.asarray(out), expected)

    print("KERNEL_OK")
</pallas_src>

<mosaic_0001>
module attributes {stable_mosaic.version = 11 : i64} {
  func.func @_identity_copy_kernel(%arg0: i32, %arg1: memref<2x1024xf32, #tpu.memory_space<vmem>>, %arg2: memref<2x1024xf32, #tpu.memory_space<vmem>>) attributes {dimension_semantics = [#tpu.dimension_semantics<parallel>], iteration_bounds = array<i64: 1>, scalar_prefetch = 0 : i64, scratch_operands = 0 : i64, tpu.core_type = #tpu.core_type<tc>, window_params = [{transform_indices = @transform_0, window_bounds = array<i64: 2, 1024>}, {transform_indices = @transform_1, window_bounds = array<i64: 2, 1024>}]} {
    %c0 = arith.constant 0 : index
    %c0_0 = arith.constant 0 : index
    %0 = vector.load %arg1[%c0, %c0_0] : memref<2x1024xf32, #tpu.memory_space<vmem>>, vector<2x1024xf32>
    %c0_1 = arith.constant 0 : index
    %c0_2 = arith.constant 0 : index
    %1 = vector.load %arg2[%c0_1, %c0_2] : memref<2x1024xf32, #tpu.memory_space<vmem>>, vector<2x1024xf32>
    tpu.vector_store %arg2[%c0_1, %c0_2], %0 {strides = array<i32>} : memref<2x1024xf32, #tpu.memory_space<vmem>>, vector<2x1024xf32>,
    return
  }
  func.func @transform_0(%arg0: i32) -> (i32, i32) {
    %c0_i32 = arith.constant 0 : i32
    %c0_i32_0 = arith.constant 0 : i32
    return %arg0, %c0_i32 : i32, i32
  }
  func.func @transform_1(%arg0: i32) -> (i32, i32) {
    %c0_i32 = arith.constant 0 : i32
    %c0_i32_0 = arith.constant 0 : i32
    return %arg0, %c0_i32 : i32, i32
  }
}

</mosaic_0001>

<bundles_post_ra>
// kernel: tpu_custom_call.1
= control target key start
LH: loop header
LB: loop body
LE: loop exit
PB: predicated region body
PF: predicated region fallthrough
CT: control target
= control target key end

     0   :  { %6 = vsyncpa [#allocation3], 0  ;;  %s104_s0 = inlined_call_operand.hbm [shape: f32[2,1024], index: 0, kind: input, shape index: {}, may-alias: {0,1}]   ;;  %s105_s1 = inlined_call_operand.hbm [shape: f32[2,1024], index: 1, kind: output, shape index: {}, may-alias: {0,1}]  }
   0x1   :  { %7 = vsyncpa [#allocation4], 0  ;;  %s86_s6 = smov [#allocation2]  }
   0x2   :  { %s14_s7 = sshll.u32 %s86_s6, 4  ;;  %s15_s7 = int_to_ptr.vmem [resolvable:$true] %s14_s7 }
   0x3   :  { %s50_s8 = scalar_lea.vmem %s15_s7, 256  ;;  %p55_p1 = scmp.lt.s32.totalorder %s15_s7, %s15_s7 }
   0x4   :  { %p51_p0 = scmp.ne.s32.totalorder %s15_s7, %s50_s8  ;;  %p56_p2 = scmp.lt.s32.totalorder %s50_s8, %s50_s8 }
   0x6   :  { %p57_p3 = por %p56_p2, %p55_p1 }
   0x8   :  { %p58_p4 = pnand %p57_p3, %p51_p0 }
   0xa   :  { %61 = shalt.err (!%p58_p4)
}
   0xb   :  { %17 = dma.hbm_to_vmem [thread:$0]  %s104_s0, 256, %s15_s7, [#allocation3]  }
   0xc   :  { %82 = dma.done.wait [#allocation3], 256  }
   0xd   :  { %83 = vsyncadd [#allocation3], 4294967040  ;;  %s87_s11 = smov [#allocation5]   ;;  %v21_v0 = vld [vmem:[#allocation2] sm:$0xff]  ;;  %v22_v1 = vld [vmem:[#allocation2 + $0x8] sm:$0xff] }
   0xe   :  { %s31_s12 = sshll.u32 %s87_s11, 4  ;;  %23 = vst [vmem:[#allocation5] sm:$0xff] %v21_v0  ;;  %24 = vst [vmem:[#allocation5 + $0x8] sm:$0xff] %v22_v1  ;;  %s32_s12 = int_to_ptr.vmem [resolvable:$true] %s31_s12 }
   0xf   :  { %s62_s13 = scalar_lea.vmem %s32_s12, 256  ;;  %p67_p6 = scmp.lt.s32.totalorder %s32_s12, %s32_s12 }
  0x10   :  { %p63_p5 = scmp.ne.s32.totalorder %s32_s12, %s62_s13  ;;  %p68_p7 = scmp.lt.s32.totalorder %s62_s13, %s62_s13 }
  0x12   :  { %p69_p8 = por %p68_p7, %p67_p6 }
  0x14   :  { %p70_p9 = pnand %p69_p8, %p63_p5 }
  0x16   :  { %73 = shalt.err (!%p70_p9)
}
  0x17   :  { %34 = dma.vmem_to_hbm [thread:$0]  %s32_s12, 256, %s105_s1, [#allocation4]  }
  0x18   :  { %84 = dma.done.wait [#allocation4], 256  }
  0x19   :  { %85 = vsyncadd [#allocation4], 4294967040 }
  0x1a   :  { %38 = vsyncpa [#allocation3], 1 }
  0x1b   :  { %39 = vsyncpa [#allocation4], 1 }

</bundles_post_ra>
